<compile_context>
chip_gen: v6e
topology: v6e:2x2x1
jax: 0.10.0
libtpu: 0.0.40
codegen_flags: <defaults>
</compile_context>

<pallas_src>
import functools

import jax
import jax.numpy as jnp
from jax.experimental import pallas as pl
from jax.experimental.pallas import tpu as pltpu


def _round_up(x, m):
    return (x + m - 1) // m * m


def _ctx_disc_kernel(hpl_ref, cext_ref, w_ref, b_ref, o_ref, *, rounds, tn):
    """One node tile: rows [i0, i0+tn) of every round's scores.

    hpl_ref : (tn, H)         bf16/f32 VMEM   node tile of h_pl
    cext_ref: (n_pad + R, H)  f32      VMEM   full extended context (resident)
    w_ref   : (H, H)          bf16/f32 VMEM   bilinear weight (resident)
    b_ref   : (1, 1)          f32      SMEM   bilinear bias
    o_ref   : (rounds, tn)    f32      VMEM   scores, node index on the lane axis
    """
    R = rounds - 1
    i0 = pl.multiple_of(pl.program_id(0) * tn, tn)

    # Single MXU matmul shared by every round (f32 accumulate).
    t = jnp.dot(hpl_ref[...], w_ref[...], preferred_element_type=jnp.float32)   # (tn, H)

    bias = b_ref[0, 0]
    for r in range(rounds):                      # static unroll; rounds is small
        # Round-r context rows for this tile: one contiguous slab of c_ext.
        c_r = cext_ref[pl.ds(i0 + (R - r), tn), :].astype(jnp.float32)          # (tn, H)
        s = jnp.sum(t * c_r, axis=-1) + bias                                    # (tn,)
        o_ref[pl.ds(r, 1), :] = s[None, :].astype(o_ref.dtype)


def contextual_discriminator(c, h_pl, weight, bias, negsamp_round,
                             s_bias1=None, s_bias2=None, *,
                             block_n=512, matmul_dtype=jnp.bfloat16):
    """Pallas TPU forward of Contextual_Discriminator.

    c, h_pl : (N, n_h)     weight : (n_h, n_h) (= nn.Bilinear weight[0])
    bias    : scalar       returns logits of shape ((negsamp_round+1)*N, 1), f32.
    s_bias1 / s_bias2 are accepted for signature parity but, as in the PyTorch
    forward, never used.
    """
    del s_bias1, s_bias2
    N, H = c.shape
    assert h_pl.shape == (N, H) and weight.shape == (H, H)
    assert N >= 2, "the torch row shuffle c[-2:-1] requires at least 2 rows"
    R = int(negsamp_round)
    rounds = R + 1

    # MXU operands in bf16 (native MXU rate on v5e/v6e/v7x, halves their HBM
    # bytes); context stays f32, all accumulation is f32.
    h_in = h_pl.astype(matmul_dtype)
    w_in = jnp.asarray(weight).astype(matmul_dtype)
    c32 = c.astype(jnp.float32)

    # Node tiling: TN multiple of 128 (lane-dense output stores), N padded to a
    # multiple of TN.  Padded h rows are zero -> padded scores are trimmed below.
    tn = min(int(block_n), _round_up(N, 128))
    n_pad = _round_up(N, tn)
    pad = n_pad - N

    # Extended context (see header): c_ext[j] = c[(j - R) mod (N-1)] for j < R,
    # c_ext[R + i] = c[i].  Round r / row i then reads c_ext[i + R - r].
    if R > 0:
        prefix = jnp.take(c32, (jnp.arange(R) - R) % (N - 1), axis=0)
    else:
        prefix = jnp.zeros((0, H), jnp.float32)
    c_ext = jnp.concatenate(
        [prefix, c32, jnp.zeros((pad, H), jnp.float32)], axis=0)       # (n_pad+R, H)
    h_padded = jnp.pad(h_in, ((0, pad), (0, 0)))
    bias_arr = jnp.asarray(bias, jnp.float32).reshape(1, 1)

    # VMEM budget: double-buffered blockspec tiles + resident c_ext + in-kernel
    # temporaries (t, one c_r slab, their product).
    mm_bytes = jnp.dtype(matmul_dtype).itemsize
    vmem_bytes = (2 * tn * H * mm_bytes            # h_pl tile  (x2 pipeline buffers)
                  + 2 * (n_pad + R) * H * 4        # resident c_ext (x2, conservative)
                  + 2 * H * H * mm_bytes           # W          (x2)
                  + 2 * rounds * tn * 4            # output tile (x2)
                  + 3 * tn * H * 4)                # t + c_r + product temporaries
    assert vmem_bytes <= 28 * 1024 * 1024, (
        f"kernel VMEM footprint {vmem_bytes} B exceeds the 28 MiB budget; "
        "reduce block_n or shard the node axis outside the kernel")
    # TODO(synk): for graphs whose full context no longer fits VMEM, move c_ext to
    # memory_space=pl.ANY and manually DMA per-tile (tn + R)-row halos instead.

    cost = pl.CostEstimate(
        flops=2 * n_pad * H * H + rounds * 2 * n_pad * H,
        transcendentals=0,
        bytes_accessed=(n_pad * H * mm_bytes + (n_pad + R) * H * 4
                        + H * H * mm_bytes + rounds * n_pad * 4),
    )

    kernel = functools.partial(_ctx_disc_kernel, rounds=rounds, tn=tn)

    out2d = pl.pallas_call(
        kernel,
        out_shape=jax.ShapeDtypeStruct((rounds, n_pad), jnp.float32),
        grid_spec=pltpu.PrefetchScalarGridSpec(
            num_scalar_prefetch=0,
            grid=(n_pad // tn,),
            in_specs=[
                pl.BlockSpec((tn, H), lambda i: (i, 0)),               # h_pl tile
                pl.BlockSpec((n_pad + R, H), lambda i: (0, 0)),        # c_ext resident
                pl.BlockSpec((H, H), lambda i: (0, 0)),                # W resident
                pl.BlockSpec(memory_space=pltpu.MemorySpace.SMEM),     # bias scalar
            ],
            out_specs=pl.BlockSpec((rounds, tn), lambda i: (0, i)),
        ),
        compiler_params=pltpu.CompilerParams(
            dimension_semantics=("parallel",),     # engages both TensorCores on v7x
            vmem_limit_bytes=32 * 1024 * 1024,     # portable across v5e/v6e/v7x
        ),
        cost_estimate=cost,
    )(h_padded, c_ext, w_in, bias_arr)

    # (rounds, n_pad) -> trim padding -> row-major flatten == torch.cat(scs).
    return out2d[:, :N].reshape(rounds * N, 1)


if __name__ == "__main__":
    key = jax.random.PRNGKey(0)
    k1, k2, k3 = jax.random.split(key, 3)

    N, H, NEGSAMP = 8, 32, 2           # nodes, hidden dim, negsamp_round

    c = jax.random.normal(k1, (N, H), dtype=jnp.float32)
    h_pl = jax.random.normal(k2, (N, H), dtype=jnp.float32)

    # nn.Bilinear(n_h, n_h, 1): xavier_uniform weight, zero bias.
    bound = (6.0 / (H + H)) ** 0.5
    W = jax.random.uniform(k3, (H, H), dtype=jnp.float32, minval=-bound, maxval=bound)
    b = jnp.zeros((), dtype=jnp.float32)

    out = contextual_discriminator(c, h_pl, W, b, NEGSAMP)
    out = jax.block_until_ready(out)
    assert out.shape == ((NEGSAMP + 1) * N, 1), out.shape

    # Pure-JAX reference replicating the torch forward.
    def ref_forward(c_in, h_in, w_in, b_in):
        def f_k(x1, x2):
            return ((x1 @ w_in) * x2).sum(-1, keepdims=True) + b_in
        scs = [f_k(h_in, c_in)]
        c_mi = c_in
        for _ in range(NEGSAMP):
            c_mi = jnp.concatenate([c_mi[-2:-1, :], c_mi[:-1, :]], axis=0)
            scs.append(f_k(h_in, c_mi))
        return jnp.concatenate(scs, axis=0)

    # Tight check vs a reference using the same bf16 MXU-operand rounding.
    ref_bf16 = ref_forward(c,
                           h_pl.astype(jnp.bfloat16).astype(jnp.float32),
                           W.astype(jnp.bfloat16).astype(jnp.float32),
                           b)
    assert jnp.allclose(out, ref_bf16, rtol=5e-3, atol=5e-3), \
        "mismatch vs matched-precision reference"

    # Loose sanity check vs the full-f32 torch-equivalent reference.
    ref_f32 = ref_forward(c, h_pl, W, b)
    assert jnp.allclose(out, ref_f32, rtol=1e-1, atol=1e-1), \
        "mismatch vs f32 reference"

    print("KERNEL_OK")
</pallas_src>

<mosaic_0001>
module attributes {stable_mosaic.version = 11 : i64} {
  func.func @_ctx_disc_kernel(%arg0: i32, %arg1: memref<128x32xbf16, #tpu.memory_space<vmem>>, %arg2: memref<130x32xf32, #tpu.memory_space<vmem>>, %arg3: memref<32x32xbf16, #tpu.memory_space<vmem>>, %arg4: memref<1x1xf32, #tpu.memory_space<smem>>, %arg5: memref<3x128xf32, #tpu.memory_space<vmem>>) attributes {dimension_semantics = [#tpu.dimension_semantics<parallel>], iteration_bounds = array<i64: 1>, scalar_prefetch = 0 : i64, scratch_operands = 0 : i64, tpu.core_type = #tpu.core_type<tc>, window_params = [{transform_indices = @transform_0, window_bounds = array<i64: 128, 32>}, {pipeline_mode = #tpu.pipeline_mode<synchronous>, transform_indices = @transform_1, window_bounds = array<i64: 130, 32>}, {pipeline_mode = #tpu.pipeline_mode<synchronous>, transform_indices = @transform_2, window_bounds = array<i64: 32, 32>}, {transform_indices = @transform_3, window_bounds = array<i64: 1, 1>}, {transform_indices = @transform_4, window_bounds = array<i64: 3, 128>}]} {
    %c128_i32 = arith.constant 128 : i32
    %0 = arith.muli %arg0, %c128_i32 : i32
    %1 = tpu.assume_multiple %0, 128 : i32
    %c0 = arith.constant 0 : index
    %c0_0 = arith.constant 0 : index
    %2 = vector.load %arg1[%c0, %c0_0] : memref<128x32xbf16, #tpu.memory_space<vmem>>, vector<128x32xbf16>
    %c0_1 = arith.constant 0 : index
    %c0_2 = arith.constant 0 : index
    %3 = vector.load %arg3[%c0_1, %c0_2] : memref<32x32xbf16, #tpu.memory_space<vmem>>, vector<32x32xbf16>
    %cst = arith.constant dense<0.000000e+00> : vector<128x32xf32>
    %4 = tpu.matmul %2, %3, %cst {dimension_numbers = #tpu.dot_dimension_numbers<[1], [0], [0], [1], [0, 0, 1, 1], [], []>} : vector<128x32xbf16>, vector<32x32xbf16>, vector<128x32xf32> -> vector<128x32xf32>
    %c0_3 = arith.constant 0 : index
    %c0_4 = arith.constant 0 : index
    %5 = memref.load %arg4[%c0_3, %c0_4] : memref<1x1xf32, #tpu.memory_space<smem>>
    %c2_i32 = arith.constant 2 : i32
    %6 = arith.addi %1, %c2_i32 : i32
    %7 = arith.index_cast %6 : i32 to index
    %c0_5 = arith.constant 0 : index
    %8 = vector.load %arg2[%7, %c0_5] : memref<130x32xf32, #tpu.memory_space<vmem>>, vector<128x32xf32>
    %9 = arith.mulf %4, %8 : vector<128x32xf32>
    %cst_6 = arith.constant dense<0.000000e+00> : vector<128xf32>
    %10 = vector.multi_reduction <add>, %9, %cst_6 [1] : vector<128x32xf32> to vector<128xf32>
    %11 = vector.broadcast %5 : f32 to vector<128xf32>
    %12 = arith.addf %10, %11 : vector<128xf32>
    %13 = vector.shape_cast %12 : vector<128xf32> to vector<1x128xf32>
    %c0_7 = arith.constant 0 : index
    %c0_8 = arith.constant 0 : index
    %14 = vector.load %arg5[%c0_7, %c0_8] : memref<3x128xf32, #tpu.memory_space<vmem>>, vector<1x128xf32>
    tpu.vector_store %arg5[%c0_7, %c0_8], %13 {strides = array<i32>} : memref<3x128xf32, #tpu.memory_space<vmem>>, vector<1x128xf32>,
    %c1_i32 = arith.constant 1 : i32
    %15 = arith.addi %1, %c1_i32 : i32
    %16 = arith.index_cast %15 : i32 to index
    %c0_9 = arith.constant 0 : index
    %17 = vector.load %arg2[%16, %c0_9] : memref<130x32xf32, #tpu.memory_space<vmem>>, vector<128x32xf32>
    %18 = arith.mulf %4, %17 : vector<128x32xf32>
    %cst_10 = arith.constant dense<0.000000e+00> : vector<128xf32>
    %19 = vector.multi_reduction <add>, %18, %cst_10 [1] : vector<128x32xf32> to vector<128xf32>
    %20 = vector.broadcast %5 : f32 to vector<128xf32>
    %21 = arith.addf %19, %20 : vector<128xf32>
    %22 = vector.shape_cast %21 : vector<128xf32> to vector<1x128xf32>
    %c1 = arith.constant 1 : index
    %c0_11 = arith.constant 0 : index
    %23 = vector.load %arg5[%c1, %c0_11] : memref<3x128xf32, #tpu.memory_space<vmem>>, vector<1x128xf32>
    tpu.vector_store %arg5[%c1, %c0_11], %22 {strides = array<i32>} : memref<3x128xf32, #tpu.memory_space<vmem>>, vector<1x128xf32>,
    %c0_i32 = arith.constant 0 : i32
    %24 = arith.addi %1, %c0_i32 : i32
    %25 = arith.index_cast %24 : i32 to index
    %c0_12 = arith.constant 0 : index
    %26 = vector.load %arg2[%25, %c0_12] : memref<130x32xf32, #tpu.memory_space<vmem>>, vector<128x32xf32>
    %27 = arith.mulf %4, %26 : vector<128x32xf32>
    %cst_13 = arith.constant dense<0.000000e+00> : vector<128xf32>
    %28 = vector.multi_reduction <add>, %27, %cst_13 [1] : vector<128x32xf32> to vector<128xf32>
    %29 = vector.broadcast %5 : f32 to vector<128xf32>
    %30 = arith.addf %28, %29 : vector<128xf32>
    %31 = vector.shape_cast %30 : vector<128xf32> to vector<1x128xf32>
    %c2 = arith.constant 2 : index
    %c0_14 = arith.constant 0 : index
    %32 = vector.load %arg5[%c2, %c0_14] : memref<3x128xf32, #tpu.memory_space<vmem>>, vector<1x128xf32>
    tpu.vector_store %arg5[%c2, %c0_14], %31 {strides = array<i32>} : memref<3x128xf32, #tpu.memory_space<vmem>>, vector<1x128xf32>,
    return
  }
  func.func @transform_0(%arg0: i32) -> (i32, i32) {
    %c0_i32 = arith.constant 0 : i32
    %c0_i32_0 = arith.constant 0 : i32
    return %arg0, %c0_i32 : i32, i32
  }
  func.func @transform_1(%arg0: i32) -> (i32, i32) {
    %c0_i32 = arith.constant 0 : i32
    %c0_i32_0 = arith.constant 0 : i32
    %c0_i32_1 = arith.constant 0 : i32
    return %c0_i32, %c0_i32_0 : i32, i32
  }
  func.func @transform_2(%arg0: i32) -> (i32, i32) {
    %c0_i32 = arith.constant 0 : i32
    %c0_i32_0 = arith.constant 0 : i32
    %c0_i32_1 = arith.constant 0 : i32
    return %c0_i32, %c0_i32_0 : i32, i32
  }
  func.func @transform_3(%arg0: i32) -> (i32, i32) {
    %c0_i32 = arith.constant 0 : i32
    %c0_i32_0 = arith.constant 0 : i32
    %c0_i32_1 = arith.constant 0 : i32
    return %c0_i32, %c0_i32_0 : i32, i32
  }
  func.func @transform_4(%arg0: i32) -> (i32, i32) {
    %c0_i32 = arith.constant 0 : i32
    %c0_i32_0 = arith.constant 0 : i32
    return %c0_i32, %arg0 : i32, i32
  }
}

</mosaic_0001>

<bundles_post_ra>
// kernel: tpu_custom_call.1
= control target key start
LH: loop header
LB: loop body
LE: loop exit
PB: predicated region body
PF: predicated region fallthrough
CT: control target
= control target key end

     0   :  { %vm93_vm0 = vcmask 261120   ;;  %s1573_s0 = inlined_call_operand.vmem [shape: bf16[128,32], index: 0, kind: input, shape index: {}]   ;;  %s1574_s1 = inlined_call_operand.vmem [shape: f32[130,32], index: 1, kind: input, shape index: {}]   ;;  %s1575_s2 = inlined_call_operand.vmem [shape: bf16[32,32], index: 2, kind: input, shape index: {}]   ;;  %s1576_s3 = inlined_call_operand.<no memory space> [shape: f32[1,1], index: 3, kind: input, shape index: {}]   ;;  %s1577_s4 = inlined_call_operand.hbm [shape: f32[3,128], index: 4, kind: output, shape index: {}]  }
   0x1   :  { %v934_v0 = vld [vmem:[%s1575_s2 + $0x8] sm:$0xff]   ;;  %v935_v1 = vld [vmem:[%s1575_s2] sm:$0xff]   ;;  %v940_v6 = vld [vmem:[%s1573_s0 + $0x10] sm:$0xff]  }
   0x2   :  { %909 = vmatprep.subr.bf16.mxu0 %v934_v0  ;;  %929 = vmatprep.subr.bf16.mxu1 %v934_v0  ;;  %v936_v2 = vld [vmem:[%s1573_s0] sm:$0xff]   ;;  %v938_v4 = vld [vmem:[%s1573_s0 + $0x8] sm:$0xff]   ;;  %v942_v7 = vld [vmem:[%s1573_s0 + $0x30] sm:$0xff]  }
   0x3   :  { %910 = vmatpush3.bf16.msra.mxu0 %v934_v0  ;;  %931 = vmatpush3.bf16.msra.mxu1 %v934_v0  ;;  %v937_v3 = vld [vmem:[%s1573_s0 + $0x20] sm:$0xff]   ;;  %v939_v5 = vld [vmem:[%s1573_s0 + $0x28] sm:$0xff]  }
   0x4   :  { %911 = vmatprep.subr.bf16.mxu0 %v935_v1  ;;  %930 = vmatprep.subr.bf16.mxu1 %v935_v1 }
   0x5   :  { %913 = vmatprep.mubr.msk.bf16.mxu0 %vm93_vm0, %v936_v2  ;;  %921 = vmatprep.mubr.msk.bf16.mxu1 %vm93_vm0, %v937_v3 }
   0x7   :  { %912 = vmatpush3.bf16.msra.mxu0 %v935_v1  ;;  %932 = vmatpush3.bf16.msra.mxu1 %v935_v1 }
   0xa   :  { %914 = vmatmul.mubr.msk.bf16.vlgmr.msra.gmra.mxu0 %vm93_vm0, %v938_v4  ;;  %922 = vmatmul.mubr.msk.bf16.vlgmr.msra.gmra.mxu1 %vm93_vm0, %v939_v5 }
   0xb   :  { %10 = vsyncpa [#allocation4], 0  ;;  %917 = vmatprep.mubr.msk.bf16.mxu0 %vm93_vm0, %v940_v6  ;;  %925 = vmatprep.mubr.msk.bf16.mxu1 %vm93_vm0, %v942_v7  ;;  %v941_v8 = vld [vmem:[%s1573_s0 + $0x18] sm:$0xff]   ;;  %v642_v10 = vld [vmem:[%s1574_s1 + $0x10] sm:$0xff]  ;;  %vm342_vm1 = vcmask 130112   ;;  %vm349_vm2 = vcmask 195712  }
   0xc   :  { %v943_v9 = vld [vmem:[%s1573_s0 + $0x38] sm:$0xff]   ;;  %v650_v22 = vld [vmem:[%s1574_s1 + $0x50] sm:$0xff]  ;;  %v883_v29 = vld [vmem:[%s1574_s1 + $0x1] sm:$0xff]  ;;  %vm356_vm3 = vcmask 261312   ;;  %vm370_vm4 = vcmask 392512   ;;  %vm363_vm5 = vcmask 326912  }
   0xd   :  { %v869_v11 = vld [vmem:[%s1574_s1 + $0x12] sm:$0xff]  ;;  %v867_v30 = vld [vmem:[%s1574_s1 + $0x2] sm:$0xff]  ;;  %v870_v50 = vld [vmem:[%s1574_s1 + $0x1a] sm:$0xff]  ;;  %vm377_vm6 = vcmask 458112   ;;  %vm384_vm7 = vcmask 523712   ;;  %vm391_vm8 = vcmask 589312  }
   0xe   :  { %v877_v12 = vld [vmem:[%s1574_s1 + $0x52] sm:$0xff]  ;;  %v640_v35 = vld [vmem:[%s1574_s1] sm:$0xff]  ;;  %v868_v0 = vld [vmem:[%s1574_s1 + $0xa] sm:$0xff]  ;;  %vm398_vm9 = vcmask 654912   ;;  %vm405_vm10 = vcmask 720512   ;;  %vm412_vm11 = vcmask 786112  }
   0xf   :  { %v885_v15 = vld [vmem:[%s1574_s1 + $0x11] sm:$0xff]  ;;  %v875_v36 = vld [vmem:[%s1574_s1 + $0x42] sm:$0xff]  ;;  %v886_v49 = vld [vmem:[%s1574_s1 + $0x19] sm:$0xff]  ;;  %vm419_vm12 = vcmask 851712   ;;  %vm426_vm13 = vcmask 917312   ;;  %vm433_vm14 = vcmask 982912  }
  0x10   :  { %v893_v23 = vld [vmem:[%s1574_s1 + $0x51] sm:$0xff]  ;;  %v891_v42 = vld [vmem:[%s1574_s1 + $0x41] sm:$0xff]  ;;  %v894_v56 = vld [vmem:[%s1574_s1 + $0x59] sm:$0xff]  ;;  %vm440_vm15 = vcmask 1048512  }
  0x11   :  { %v648_v43 = vld [vmem:[%s1574_s1 + $0x40] sm:$0xff]  ;;  %v643_v57 = vld [vmem:[%s1574_s1 + $0x18] sm:$0xff]  ;;  %v884_v6 = vld [vmem:[%s1574_s1 + $0x9] sm:$0xff] }
  0x12   :  { %918 = vmatmul.mubr.msk.bf16.gmra.mxu0 %vm93_vm0, %v941_v8  ;;  %926 = vmatmul.mubr.msk.bf16.gmra.mxu1 %vm93_vm0, %v943_v9  ;;  %v878_v63 = vld [vmem:[%s1574_s1 + $0x5a] sm:$0xff] }
  0x13   :  { %v651_v5 = vld [vmem:[%s1574_s1 + $0x58] sm:$0xff] }
  0xca   :  { %v915_v13 = vpop.f32.mrf.mxu0  ;;  %v923_v14 = vpop.f32.mrf.mxu1 }
  0xcb   :  { %v658_v16 = vmul.f32 %v915_v13, %v642_v10  ;;  %v236_v17 = vmul.f32 %v915_v13, %v869_v11  ;;  %v244_v18 = vmul.f32 %v923_v14, %v877_v12  ;;  %v464_v21 = vmul.f32 %v915_v13, %v885_v15  ;;  %v876_v12 = vld [vmem:[%s1574_s1 + $0x4a] sm:$0xff] }
  0xcc   :  { %v666_v26 = vmul.f32 %v923_v14, %v650_v22  ;;  %v472_v27 = vmul.f32 %v923_v14, %v893_v23  ;;  %v152_v28 = vpop.f32.mrf.mxu0  ;;  %v184_v37 = vpop.f32.mrf.mxu1  ;;  %v641_v13 = vld [vmem:[%s1574_s1 + $0x8] sm:$0xff] }
  0xcd   :  { %v678_v19 = vsel %vm93_vm0, %v658_v16, 0.0  ;;  %v256_v20 = vsel %vm93_vm0, %v236_v17, 0.0  ;;  %v280_v24 = vsel %vm93_vm0, %v244_v18, 0.0  ;;  %v484_v25 = vsel %vm93_vm0, %v464_v21, 0.0  ;;  %v649_v18 = vld [vmem:[%s1574_s1 + $0x48] sm:$0xff]  ;;  %v873_v21 = vld [vmem:[%s1574_s1 + $0x32] sm:$0xff] }
  0xce   :  { %679 = vadd.xlane.f32.xlu0 %v678_v19  ;;  %257 = vadd.xlane.f32.xlu1 %v256_v20  ;;  %v702_v31 = vsel %vm93_vm0, %v666_v26, 0.0  ;;  %v508_v32 = vsel %vm93_vm0, %v472_v27, 0.0  ;;  %v462_v33 = vmul.f32 %v883_v29, %v152_v28  ;;  %v234_v34 = vmul.f32 %v867_v30, %v152_v28  ;;  %v916_v48 = vpop.f32.mrf.mxu0  ;;  %v924_v55 = vpop.f32.mrf.mxu1  ;;  %v892_v19 = vld [vmem:[%s1574_s1 + $0x49] sm:$0xff]  ;;  %v889_v20 = vld [vmem:[%s1574_s1 + $0x31] sm:$0xff] }
  0xcf   :  { %v656_v40 = vmul.f32 %v640_v35, %v152_v28  ;;  %v242_v41 = vmul.f32 %v875_v36, %v184_v37  ;;  %v470_v46 = vmul.f32 %v891_v42, %v184_v37  ;;  %v664_v47 = vmul.f32 %v648_v43, %v184_v37  ;;  %v897_v29 = vld [vmem:[%s1574_s1 + $0x71] sm:$0xff] }
  0xd0   :  { %v478_v38 = vsel %vm93_vm0, %v462_v33, 0.0  ;;  %v250_v39 = vsel %vm93_vm0, %v234_v34, 0.0  ;;  %v465_v53 = vmul.f32 %v916_v48, %v886_v49  ;;  %v237_v54 = vmul.f32 %v916_v48, %v870_v50  ;;  %v155_v62 = vpop.f32.mrf.mxu0  ;;  %v187_v11 = vpop.f32.mrf.mxu1  ;;  %v646_v33 = vld [vmem:[%s1574_s1 + $0x30] sm:$0xff] }
  0xd1   :  { %v672_v44 = vsel %vm93_vm0, %v656_v40, 0.0  ;;  %v274_v45 = vsel %vm93_vm0, %v242_v41, 0.0  ;;  %v502_v51 = vsel %vm93_vm0, %v470_v46, 0.0  ;;  %v696_v52 = vsel %vm93_vm0, %v664_v47, 0.0  ;;  %v871_v46 = vld [vmem:[%s1574_s1 + $0x22] sm:$0xff] }
  0xd2   :  { %281 = vadd.xlane.f32.xlu0 %v280_v24  ;;  %485 = vadd.xlane.f32.xlu1 %v484_v25  ;;  %v487_v58 = vsel %vm93_vm0, %v465_v53, 0.0  ;;  %v259_v59 = vsel %vm93_vm0, %v237_v54, 0.0  ;;  %v473_v60 = vmul.f32 %v924_v55, %v894_v56  ;;  %v659_v61 = vmul.f32 %v916_v48, %v643_v57  ;;  %v919_v26 = vpop.f32.mrf.mxu0  ;;  %v874_v53 = vld [vmem:[%s1574_s1 + $0x3a] sm:$0xff] }
  0xd3   :  { %v245_v3 = vmul.f32 %v924_v55, %v878_v63  ;;  %v235_v4 = vmul.f32 %v868_v0, %v155_v62  ;;  %v667_v9 = vmul.f32 %v924_v55, %v651_v5  ;;  %v463_v10 = vmul.f32 %v884_v6, %v155_v62 }
  0xd4   :  { %v511_v1 = vsel %vm93_vm0, %v473_v60, 0.0  ;;  %v681_v2 = vsel %vm93_vm0, %v659_v61, 0.0  ;;  %v243_v16 = vmul.f32 %v876_v12, %v187_v11  ;;  %v657_v17 = vmul.f32 %v641_v13, %v155_v62  ;;  %v168_v41 = vpop.f32.mrf.mxu0  ;;  %v647_v60 = vld [vmem:[%s1574_s1 + $0x38] sm:$0xff] }
  0xd5   :  { %v283_v7 = vsel %vm93_vm0, %v245_v3, 0.0  ;;  %v253_v8 = vsel %vm93_vm0, %v235_v4, 0.0  ;;  %v705_v14 = vsel %vm93_vm0, %v667_v9, 0.0  ;;  %v481_v15 = vsel %vm93_vm0, %v463_v10, 0.0  ;;  %v652_v3 = vld [vmem:[%s1574_s1 + $0x60] sm:$0xff] }
  0xd6   :  { %703 = vadd.xlane.f32.xlu0 %v702_v31  ;;  %509 = vadd.xlane.f32.xlu1 %v508_v32  ;;  %v277_v22 = vsel %vm93_vm0, %v243_v16, 0.0  ;;  %v675_v23 = vsel %vm93_vm0, %v657_v17, 0.0  ;;  %v665_v24 = vmul.f32 %v649_v18, %v187_v11  ;;  %v471_v25 = vmul.f32 %v892_v19, %v187_v11  ;;  %v1135_v32 = vpop.f32.mrf.mxu1  ;;  %v920_v54 = vpop.f32.mrf.mxu0  ;;  %v882_v9 = vld [vmem:[%s1574_s1 + $0x7a] sm:$0xff]  ;;  %v645_v16 = vld [vmem:[%s1574_s1 + $0x28] sm:$0xff] }
  0xd7   :  { %v468_v27 = vmul.f32 %v919_v26, %v889_v20  ;;  %v240_v28 = vmul.f32 %v919_v26, %v873_v21  ;;  %v476_v36 = vmul.f32 %v1135_v32, %v897_v29  ;;  %v662_v37 = vmul.f32 %v919_v26, %v646_v33  ;;  %v653_v29 = vld [vmem:[%s1574_s1 + $0x68] sm:$0xff] }
  0xd8   :  { %v699_v30 = vsel %vm93_vm0, %v665_v24, 0.0  ;;  %v505_v31 = vsel %vm93_vm0, %v471_v25, 0.0  ;;  %v200_v47 = vpop.f32.mrf.mxu1  ;;  %v663_v0 = vmul.f32 %v920_v54, %v647_v60 }
  0xd9   :  { %v496_v34 = vsel %vm93_vm0, %v468_v27, 0.0  ;;  %v268_v35 = vsel %vm93_vm0, %v240_v28, 0.0  ;;  %v520_v40 = vsel %vm93_vm0, %v476_v36, 0.0  ;;  %v690_v42 = vsel %vm93_vm0, %v662_v37, 0.0  ;;  %v896_v28 = vld [vmem:[%s1574_s1 + $0x69] sm:$0xff] }
  0xda   :  { %479 = vadd.xlane.f32.xlu1 %v478_v38  ;;  %251 = vadd.xlane.f32.xlu0 %v250_v39  ;;  %v881_v38 = vld [vmem:[%s1574_s1 + $0x72] sm:$0xff]  ;;  %v887_v39 = vld [vmem:[%s1574_s1 + $0x21] sm:$0xff]  ;;  %v693_v6 = vsel %vm93_vm0, %v663_v0, 0.0  ;;  %v928_v10 = vpop.f32.mrf.mxu1  ;;  %v1262_v0 = vstv %s1576_s3  ;;  %s966_s3 = smov [#allocation3]  }
  0xdb   :  { %v248_v43 = vmul.f32 %v1135_v32, %v881_v38  ;;  %s839_s20 = sshll.u32 %s966_s3, 4  ;;  %s840_s20 = int_to_ptr.vmem [resolvable:$true] %s839_s20 }
  0xdc   :  { %v203_v21 = vpop.f32.mrf.mxu1  ;;  %s944_s21 = scalar_lea.vmem %s840_s20, 64  ;;  %p949_p1 = scmp.lt.s32.totalorder %s840_s20, %s840_s20 }
  0xdd   :  { %v292_v48 = vsel %vm93_vm0, %v248_v43, 0.0  ;;  %p945_p0 = scmp.ne.s32.totalorder %s840_s20, %s944_s21  ;;  %p950_p2 = scmp.lt.s32.totalorder %s944_s21, %s944_s21 }
  0xde   :  { %673 = vadd.xlane.f32.xlu1 %v672_v44  ;;  %275 = vadd.xlane.f32.xlu0 %v274_v45  ;;  %v466_v44 = vmul.f32 %v887_v39, %v168_v41  ;;  %v895_v45 = vld [vmem:[%s1574_s1 + $0x61] sm:$0xff] }
  0xdf   :  { %v474_v50 = vmul.f32 %v895_v45, %v200_v47  ;;  %p951_p3 = por %p950_p2, %p949_p1 }
  0xe0   :  { %v490_v49 = vsel %vm93_vm0, %v466_v44, 0.0 }
  0xe1   :  { %v514_v55 = vsel %vm93_vm0, %v474_v50, 0.0  ;;  %p952_p4 = pnand %p951_p3, %p945_p0 }
  0xe2   :  { %503 = vadd.xlane.f32.xlu1 %v502_v51  ;;  %697 = vadd.xlane.f32.xlu0 %v696_v52  ;;  %v238_v51 = vmul.f32 %v871_v46, %v168_v41  ;;  %v644_v52 = vld [vmem:[%s1574_s1 + $0x20] sm:$0xff] }
  0xe3   :  { %v660_v57 = vmul.f32 %v644_v52, %v168_v41 }
  0xe4   :  { %v262_v56 = vsel %vm93_vm0, %v238_v51, 0.0 }
  0xe5   :  { %v684_v61 = vsel %vm93_vm0, %v660_v57, 0.0 }
  0xe6   :  { %488 = vadd.xlane.f32.xlu0 %v487_v58  ;;  %260 = vadd.xlane.f32.xlu1 %v259_v59  ;;  %v241_v58 = vmul.f32 %v920_v54, %v874_v53  ;;  %v879_v59 = vld [vmem:[%s1574_s1 + $0x62] sm:$0xff] }
  0xe7   :  { %v246_v63 = vmul.f32 %v879_v59, %v200_v47 }
  0xe8   :  { %v271_v62 = vsel %vm93_vm0, %v241_v58, 0.0 }
  0xe9   :  { %v286_v5 = vsel %vm93_vm0, %v246_v63, 0.0 }
  0xea   :  { %512 = vadd.xlane.f32.xlu0 %v511_v1  ;;  %682 = vadd.xlane.f32.xlu1 %v681_v2  ;;  %v171_v1 = vpop.f32.mrf.mxu0  ;;  %v872_v2 = vld [vmem:[%s1574_s1 + $0x2a] sm:$0xff] }
  0xeb   :  { %v239_v4 = vmul.f32 %v872_v2, %v171_v1  ;;  %v661_v18 = vmul.f32 %v645_v16, %v171_v1 }
  0xed   :  { %v265_v12 = vsel %vm93_vm0, %v239_v4, 0.0  ;;  %v687_v26 = vsel %vm93_vm0, %v661_v18, 0.0 }
  0xee   :  { %284 = vadd.xlane.f32.xlu1 %v283_v7  ;;  %254 = vadd.xlane.f32.xlu0 %v253_v8  ;;  %v668_v7 = vmul.f32 %v652_v3, %v200_v47  ;;  %v890_v8 = vld [vmem:[%s1574_s1 + $0x39] sm:$0xff] }
  0xef   :  { %v469_v13 = vmul.f32 %v920_v54, %v890_v8 }
  0xf0   :  { %v708_v11 = vsel %vm93_vm0, %v668_v7, 0.0 }
  0xf1   :  { %v499_v19 = vsel %vm93_vm0, %v469_v13, 0.0 }
  0xf2   :  { %706 = vadd.xlane.f32.xlu1 %v705_v14  ;;  %482 = vadd.xlane.f32.xlu0 %v481_v15  ;;  %v249_v14 = vmul.f32 %v928_v10, %v882_v9  ;;  %v888_v15 = vld [vmem:[%s1574_s1 + $0x29] sm:$0xff] }
  0xf3   :  { %v467_v17 = vmul.f32 %v888_v15, %v171_v1 }
  0xf4   :  { %v295_v20 = vsel %vm93_vm0, %v249_v14, 0.0 }
  0xf5   :  { %v493_v25 = vsel %vm93_vm0, %v467_v17, 0.0 }
  0xf6   :  { %278 = vadd.xlane.f32.xlu1 %v277_v22  ;;  %676 = vadd.xlane.f32.xlu0 %v675_v23  ;;  %v880_v22 = vld [vmem:[%s1574_s1 + $0x6a] sm:$0xff] }
  0xf7   :  { %v654_v23 = vld [vmem:[%s1574_s1 + $0x70] sm:$0xff]  ;;  %v247_v24 = vmul.f32 %v880_v22, %v203_v21 }
  0xf8   :  { %v670_v27 = vmul.f32 %v1135_v32, %v654_v23  ;;  %v898_v32 = vld [vmem:[%s1574_s1 + $0x79] sm:$0xff] }
  0xf9   :  { %v477_v38 = vmul.f32 %v928_v10, %v898_v32 }
  0xfa   :  { %700 = vadd.xlane.f32.xlu1 %v699_v30  ;;  %506 = vadd.xlane.f32.xlu0 %v505_v31  ;;  %v475_v30 = vmul.f32 %v896_v28, %v203_v21  ;;  %v669_v31 = vmul.f32 %v653_v29, %v203_v21  ;;  %v714_v33 = vsel %vm93_vm0, %v670_v27, 0.0 }
  0xfc   :  { %v517_v36 = vsel %vm93_vm0, %v475_v30, 0.0  ;;  %v711_v37 = vsel %vm93_vm0, %v669_v31, 0.0 }
  0xfe   :  { %497 = vadd.xlane.f32.xlu1 %v496_v34  ;;  %269 = vadd.xlane.f32.xlu0 %v268_v35  ;;  %v289_v34 = vsel %vm93_vm0, %v247_v24, 0.0  ;;  %v655_v35 = vld [vmem:[%s1574_s1 + $0x78] sm:$0xff] }
  0xff   :  { %v671_v39 = vmul.f32 %v928_v10, %v655_v35 }
 0x101   :  { %v717_v41 = vsel %vm93_vm0, %v671_v39, 0.0 }
 0x102   :  { %521 = vadd.xlane.f32.xlu1 %v520_v40  ;;  %691 = vadd.xlane.f32.xlu0 %v690_v42  ;;  %v523_v40 = vsel %vm93_vm0, %v477_v38, 0.0 }
 0x106   :  { %293 = vadd.xlane.f32.xlu0 %v292_v48  ;;  %491 = vadd.xlane.f32.xlu1 %v490_v49 }
 0x10a   :  { %515 = vadd.xlane.f32.xlu1 %v514_v55  ;;  %263 = vadd.xlane.f32.xlu0 %v262_v56  ;;  %v331_v56 = vlaneseq }
 0x10c   :  { %v332_v59 = vand.u32 127, %v331_v56 }
 0x10e   :  { %685 = vadd.xlane.f32.xlu0 %v684_v61  ;;  %272 = vadd.xlane.f32.xlu1 %v271_v62  ;;  %v1257_v62 = vshrl.u32 %v331_v56, 7  ;;  %v337_v63 = vadd.s32 4294967288, %v332_v59  ;;  %v344_v1 = vadd.s32 4294967280, %v332_v59  ;;  %v400_v23 = vadd.s32 4294967216, %v332_v59 }
 0x10f   :  { %v386_v24 = vadd.s32 4294967232, %v332_v59  ;;  %v393_v27 = vadd.s32 4294967224, %v332_v59  ;;  %v372_v30 = vadd.s32 4294967248, %v332_v59  ;;  %v428_v31 = vadd.s32 4294967184, %v332_v59 }
 0x110   :  { %v1265_v2 = vsub.s32 %v332_v59, %v1257_v62  ;;  %v1272_v7 = vsub.s32 %v337_v63, %v1257_v62  ;;  %v1276_v9 = vsub.s32 %v344_v1, %v1257_v62  ;;  %v414_v35 = vadd.s32 4294967200, %v332_v59 }
 0x111   :  { %v1307_v32 = vsub.s32 %v386_v24, %v1257_v62  ;;  %v365_v38 = vadd.s32 4294967256, %v332_v59  ;;  %v435_v39 = vadd.s32 4294967176, %v332_v59  ;;  %v1321_v56 = vsub.s32 %v393_v27, %v1257_v62 }
 0x112   :  { %287 = vadd.xlane.f32.xlu0 %v286_v5  ;;  %694 = vadd.xlane.f32.xlu1 %v693_v6 }
 0x116   :  { %709 = vadd.xlane.f32.xlu0 %v708_v11  ;;  %266 = vadd.xlane.f32.xlu1 %v265_v12 }
 0x11a   :  { %500 = vadd.xlane.f32.xlu0 %v499_v19  ;;  %296 = vadd.xlane.f32.xlu1 %v295_v20 }
 0x11e   :  { %494 = vadd.xlane.f32.xlu0 %v493_v25  ;;  %688 = vadd.xlane.f32.xlu1 %v687_v26  ;;  %v351_v25 = vadd.s32 4294967272, %v332_v59  ;;  %v407_v26 = vadd.s32 4294967208, %v332_v59 }
 0x122   :  { %715 = vadd.xlane.f32.xlu0 %v714_v33  ;;  %290 = vadd.xlane.f32.xlu1 %v289_v34  ;;  %v358_v33 = vadd.s32 4294967264, %v332_v59  ;;  %v1304_v34 = vsub.s32 %v400_v23, %v1257_v62 }
 0x126   :  { %518 = vadd.xlane.f32.xlu0 %v517_v36  ;;  %712 = vadd.xlane.f32.xlu1 %v711_v37  ;;  %v379_v36 = vadd.s32 4294967240, %v332_v59  ;;  %v1310_v37 = vsub.s32 %v351_v25, %v1257_v62 }
 0x12a   :  { %524 = vadd.xlane.f32.xlu0 %v523_v40  ;;  %718 = vadd.xlane.f32.xlu1 %v717_v41  ;;  %v421_v40 = vadd.s32 4294967192, %v332_v59  ;;  %v1328_v59 = vsub.s32 %v372_v30, %v1257_v62 }
 0x157   :  { %v1227_v42 = vpop.xlane.xlu0 %679  ;;  %v1229_v43 = vpop.xlane.xlu1 %257 }
 0x158   :  { %v1314_v41 = vadd.f32 %v1227_v42, %v1262_v0  ;;  %v1331_v42 = vsub.s32 %v428_v31, %v1257_v62 }
 0x15b   :  { %v1231_v44 = vpop.xlane.xlu0 %281  ;;  %v486_v45 = vpop.xlane.xlu1 %485 }
 0x15c   :  { %v528_v4 = vadd.f32 %v486_v45, %v1262_v0  ;;  %v1317_v45 = vsub.s32 %v407_v26, %v1257_v62 }
 0x15e   :  { %v570_v12 = vrot.slane %v528_v4, %v1276_v9  ;;  %v1334_v4 = vsub.s32 %v358_v33, %v1257_v62 }
 0x15f   :  { %v1233_v46 = vpop.xlane.xlu0 %703  ;;  %v1235_v47 = vpop.xlane.xlu1 %509 }
 0x163   :  { %v480_v48 = vpop.xlane.xlu1 %479  ;;  %v1237_v49 = vpop.xlane.xlu0 %251 }
 0x164   :  { %v526_v3 = vadd.f32 %v480_v48, %v1262_v0 }
 0x166   :  { %v561_v10 = vrot.slane %v526_v3, %v1265_v2  ;;  %v301_v3 = vadd.f32 %v1262_v0, %v1229_v43  ;;  %v1346_v43 = vsub.s32 %v379_v36, %v1257_v62 }
 0x167   :  { %v1239_v50 = vpop.xlane.xlu1 %673  ;;  %v1241_v51 = vpop.xlane.xlu0 %275 }
 0x168   :  { %v348_v26 = vrot.slane %v301_v3, %v1276_v9  ;;  %v720_v27 = vadd.f32 %v1239_v50, %v1262_v0 }
 0x16b   :  { %v1243_v52 = vpop.xlane.xlu1 %503  ;;  %v1245_v53 = vpop.xlane.xlu0 %697 }
 0x16c   :  { %v1378_v30 = vadd.f32 %v1243_v52, %v1262_v0  ;;  %v1385_v31 = vadd.f32 %v1245_v53, %v1262_v0 }
 0x16f   :  { %v1247_v54 = vpop.xlane.xlu0 %488  ;;  %v1249_v55 = vpop.xlane.xlu1 %260 }
 0x170   :  { %v529_v50 = vadd.f32 %v1247_v54, %v1262_v0  ;;  %v302_v52 = vadd.f32 %v1262_v0, %v1249_v55 }
 0x173   :  { %v1251_v57 = vpop.xlane.xlu0 %512  ;;  %v1253_v58 = vpop.xlane.xlu1 %682 }
 0x174   :  { %v723_v33 = vadd.f32 %v1253_v58, %v1262_v0 }
 0x176   :  { %v769_v3 = vrot.slane %v723_v33, %v1310_v37 }
 0x177   :  { %v1255_v60 = vpop.xlane.xlu1 %284  ;;  %v255_v61 = vpop.xlane.xlu0 %254 }
 0x178   :  { %v300_v48 = vadd.f32 %v1262_v0, %v255_v61  ;;  %v1338_v61 = vadd.f32 %v1262_v0, %v1231_v44  ;;  %v1356_v44 = vsub.s32 %v435_v39, %v1257_v62  ;;  %v600_v39 = vrot.slane %v1378_v30, %v1307_v32 }
 0x17b   :  { %v1269_v5 = vpop.xlane.xlu1 %706  ;;  %v483_v6 = vpop.xlane.xlu0 %482 }
 0x17c   :  { %v527_v8 = vadd.f32 %v483_v6, %v1262_v0  ;;  %v299_v6 = vadd.f32 %v1262_v0, %v1237_v49  ;;  %v764_v49 = vrot.slane %v1314_v41, %v1276_v9  ;;  %v1395_v9 = vadd.f32 %v1251_v57, %v1262_v0 }
 0x17d   :  { %v755_v57 = vrot.slane %v720_v27, %v1265_v2  ;;  %v575_v41 = vrot.slane %v529_v50, %v1310_v37 }
 0x17e   :  { %v565_v11 = vrot.slane %v527_v8, %v1272_v7  ;;  %v1343_v8 = vsub.s32 %v414_v35, %v1257_v62 }
 0x17f   :  { %v1281_v13 = vpop.xlane.xlu1 %278  ;;  %v677_v14 = vpop.xlane.xlu0 %676 }
 0x180   :  { %v566_v15 = vsel %vm342_vm1, %v565_v11, %v561_v10  ;;  %v1350_v10 = vadd.f32 %v1233_v46, %v1262_v0  ;;  %v1353_v11 = vsub.s32 %v365_v38, %v1257_v62  ;;  %v341_v46 = vrot.slane %v300_v48, %v1272_v7 }
 0x181   :  { %v1285_v16 = vsel %vm349_vm2, %v570_v12, %v566_v15  ;;  %v1359_v12 = vsub.s32 %v421_v40, %v1257_v62  ;;  %v1365_v15 = vadd.f32 %v1235_v47, %v1262_v0  ;;  %v721_v23 = vadd.f32 %v677_v14, %v1262_v0 }
 0x182   :  { %v1374_v62 = vadd.f32 %v1262_v0, %v1241_v51  ;;  %v404_v47 = vrot.slane %v1338_v61, %v1304_v34  ;;  %v336_v14 = vrot.slane %v299_v6, %v1265_v2  ;;  %v804_v51 = vrot.slane %v1350_v10, %v1304_v34 }
 0x183   :  { %v1287_v17 = vpop.xlane.xlu1 %700  ;;  %v1289_v18 = vpop.xlane.xlu0 %506  ;;  %v610_v53 = vrot.slane %v1365_v15, %v1304_v34  ;;  %v759_v35 = vrot.slane %v721_v23, %v1272_v7  ;;  %v1413_v40 = vadd.f32 %v1262_v0, %v1255_v60  ;;  %v794_v7 = vrot.slane %v1385_v31, %v1307_v32 }
 0x184   :  { %v343_v54 = vsel %vm342_vm1, %v341_v46, %v336_v14  ;;  %v390_v58 = vrot.slane %v1374_v62, %v1307_v32  ;;  %v1420_v48 = vadd.f32 %v1269_v5, %v1262_v0  ;;  %v308_v2 = vadd.f32 %v1262_v0, %v1281_v13 }
 0x185   :  { %v615_v60 = vrot.slane %v1395_v9, %v1317_v45  ;;  %v350_v6 = vsel %vm349_vm2, %v348_v26, %v343_v54  ;;  %v760_v46 = vsel %vm342_vm1, %v759_v35, %v755_v57  ;;  %v1432_v5 = vadd.f32 %v1287_v17, %v1262_v0 }
 0x186   :  { %v411_v14 = vrot.slane %v1413_v40, %v1317_v45  ;;  %v809_v17 = vrot.slane %v1420_v48, %v1317_v45  ;;  %v765_v54 = vsel %vm349_vm2, %v764_v49, %v760_v46 }
 0x187   :  { %v1291_v19 = vpop.xlane.xlu1 %497  ;;  %v1293_v20 = vpop.xlane.xlu0 %269 }
 0x188   :  { %v305_v13 = vadd.f32 %v1262_v0, %v1293_v20  ;;  %v397_v20 = vrot.slane %v308_v2, %v1321_v56 }
 0x18a   :  { %v376_v57 = vrot.slane %v305_v13, %v1328_v59 }
 0x18b   :  { %v1295_v21 = vpop.xlane.xlu1 %521  ;;  %v1297_v22 = vpop.xlane.xlu0 %691 }
 0x18f   :  { %v1299_v28 = vpop.xlane.xlu0 %293  ;;  %v1301_v29 = vpop.xlane.xlu1 %491 }
 0x190   :  { %v313_v46 = vadd.f32 %v1262_v0, %v1299_v28 }
 0x193   :  { %v1323_v63 = vpop.xlane.xlu1 %515  ;;  %v264_v1 = vpop.xlane.xlu0 %263 }
 0x194   :  { %v303_v36 = vadd.f32 %v1262_v0, %v264_v1  ;;  %v355_v1 = vrot.slane %v302_v52, %v1310_v37  ;;  %v1441_v37 = vadd.f32 %v1289_v18, %v1262_v0  ;;  %v532_v52 = vadd.f32 %v1291_v19, %v1262_v0 }
 0x195   :  { %v576_v18 = vsel %vm356_vm3, %v575_v41, %v1285_v16  ;;  %v726_v16 = vadd.f32 %v1297_v22, %v1262_v0 }
 0x196   :  { %v362_v23 = vrot.slane %v303_v36, %v1334_v4  ;;  %v357_v33 = vsel %vm356_vm3, %v355_v1, %v350_v6  ;;  %v799_v36 = vrot.slane %v1432_v5, %v1321_v56  ;;  %v605_v49 = vrot.slane %v1441_v37, %v1321_v56 }
 0x197   :  { %v686_v24 = vpop.xlane.xlu0 %685  ;;  %v273_v25 = vpop.xlane.xlu1 %272  ;;  %v590_v6 = vrot.slane %v532_v52, %v1328_v59 }
 0x198   :  { %v306_v26 = vadd.f32 %v1262_v0, %v273_v25  ;;  %v530_v25 = vadd.f32 %v1301_v29, %v1262_v0  ;;  %v364_v19 = vsel %vm363_vm5, %v362_v23, %v357_v33  ;;  %v724_v40 = vadd.f32 %v686_v24, %v1262_v0 }
 0x199   :  { %v770_v24 = vsel %vm356_vm3, %v769_v3, %v765_v54  ;;  %v1475_v23 = vadd.f32 %v1295_v21, %v1262_v0  ;;  %v784_v21 = vrot.slane %v726_v16, %v1328_v59 }
 0x19a   :  { %v383_v29 = vrot.slane %v306_v26, %v1346_v43  ;;  %v580_v22 = vrot.slane %v530_v25, %v1334_v4  ;;  %v774_v26 = vrot.slane %v724_v40, %v1334_v4 }
 0x19b   :  { %v1404_v38 = vpop.xlane.xlu0 %287  ;;  %v695_v55 = vpop.xlane.xlu1 %694  ;;  %v630_v45 = vrot.slane %v1475_v23, %v1331_v42 }
 0x19c   :  { %v727_v28 = vadd.f32 %v695_v55, %v1262_v0  ;;  %v311_v4 = vadd.f32 %v1262_v0, %v1404_v38  ;;  %v581_v59 = vsel %vm363_vm5, %v580_v22, %v576_v18 }
 0x19e   :  { %v789_v38 = vrot.slane %v727_v28, %v1346_v43 }
 0x19f   :  { %v710_v27 = vpop.xlane.xlu0 %709  ;;  %v267_v62 = vpop.xlane.xlu1 %266 }
 0x1a0   :  { %v304_v50 = vadd.f32 %v1262_v0, %v267_v62  ;;  %v538_v62 = vadd.f32 %v1323_v63, %v1262_v0  ;;  %v732_v55 = vadd.f32 %v710_v27, %v1262_v0 }
 0x1a2   :  { %v369_v35 = vrot.slane %v304_v50, %v1353_v11  ;;  %v620_v40 = vrot.slane %v538_v62, %v1343_v8 }
 0x1a3   :  { %v501_v2 = vpop.xlane.xlu0 %500  ;;  %v297_v1 = vpop.xlane.xlu1 %296 }
 0x1a4   :  { %v371_v41 = vsel %vm370_vm4, %v369_v35, %v364_v19  ;;  %v533_v50 = vadd.f32 %v501_v2, %v1262_v0  ;;  %v432_v35 = vrot.slane %v313_v46, %v1331_v42  ;;  %v775_v2 = vsel %vm363_vm5, %v774_v26, %v770_v24 }
 0x1a5   :  { %v378_v13 = vsel %vm377_vm6, %v376_v57, %v371_v41  ;;  %v314_v57 = vadd.f32 %v1262_v0, %v297_v1  ;;  %v814_v41 = vrot.slane %v732_v55, %v1343_v8 }
 0x1a6   :  { %v385_v37 = vsel %vm384_vm7, %v383_v29, %v378_v13  ;;  %v595_v27 = vrot.slane %v533_v50, %v1346_v43 }
 0x1a7   :  { %v392_v3 = vsel %vm391_vm8, %v390_v58, %v385_v37  ;;  %v495_v52 = vpop.xlane.xlu0 %494  ;;  %v689_v33 = vpop.xlane.xlu1 %688  ;;  %v439_v43 = vrot.slane %v314_v57, %v1356_v44 }
 0x1a8   :  { %v531_v54 = vadd.f32 %v495_v52, %v1262_v0  ;;  %v725_v63 = vadd.f32 %v689_v33, %v1262_v0  ;;  %v399_v25 = vsel %vm398_vm9, %v397_v20, %v392_v3 }
 0x1a9   :  { %v406_v58 = vsel %vm405_vm10, %v404_v47, %v399_v25 }
 0x1aa   :  { %v585_v19 = vrot.slane %v531_v54, %v1353_v11  ;;  %v779_v20 = vrot.slane %v725_v63, %v1353_v11  ;;  %v413_v1 = vsel %vm412_vm11, %v411_v14, %v406_v58  ;;  %v418_v11 = vrot.slane %v311_v4, %v1343_v8 }
 0x1ab   :  { %v716_v16 = vpop.xlane.xlu0 %715  ;;  %v291_v61 = vpop.xlane.xlu1 %290 }
 0x1ac   :  { %v586_v47 = vsel %vm370_vm4, %v585_v19, %v581_v59  ;;  %v780_v18 = vsel %vm370_vm4, %v779_v20, %v775_v2  ;;  %v312_v29 = vadd.f32 %v1262_v0, %v291_v61  ;;  %v420_v37 = vsel %vm419_vm12, %v418_v11, %v413_v1 }
 0x1ad   :  { %v591_v46 = vsel %vm377_vm6, %v590_v6, %v586_v47  ;;  %v785_v24 = vsel %vm377_vm6, %v784_v21, %v780_v18  ;;  %v734_v6 = vadd.f32 %v716_v16, %v1262_v0 }
 0x1ae   :  { %v596_v13 = vsel %vm384_vm7, %v595_v27, %v591_v46  ;;  %v790_v22 = vsel %vm384_vm7, %v789_v38, %v785_v24  ;;  %v425_v62 = vrot.slane %v312_v29, %v1359_v12 }
 0x1af   :  { %v601_v14 = vsel %vm391_vm8, %v600_v39, %v596_v13  ;;  %v795_v8 = vsel %vm391_vm8, %v794_v7, %v790_v22  ;;  %v519_v26 = vpop.xlane.xlu0 %518  ;;  %v713_v28 = vpop.xlane.xlu1 %712  ;;  %v824_v48 = vrot.slane %v734_v6, %v1331_v42 }
 0x1b0   :  { %v427_v3 = vsel %vm426_vm13, %v425_v62, %v420_v37  ;;  %v606_v50 = vsel %vm398_vm9, %v605_v49, %v601_v14  ;;  %v539_v52 = vadd.f32 %v519_v26, %v1262_v0  ;;  %v800_v30 = vsel %vm398_vm9, %v799_v36, %v795_v8 }
 0x1b1   :  { %v611_v32 = vsel %vm405_vm10, %v610_v53, %v606_v50  ;;  %v805_v31 = vsel %vm405_vm10, %v804_v51, %v800_v30  ;;  %v733_v39 = vadd.f32 %v713_v28, %v1262_v0  ;;  %v434_v7 = vsel %vm433_vm14, %v432_v35, %v427_v3 }
 0x1b2   :  { %v616_v56 = vsel %vm412_vm11, %v615_v60, %v611_v32  ;;  %v625_v5 = vrot.slane %v539_v52, %v1359_v12  ;;  %v810_v15 = vsel %vm412_vm11, %v809_v17, %v805_v31  ;;  %v441_v34 = vsel %vm440_vm15, %v439_v43, %v434_v7 }
 0x1b3   :  { %v621_v10 = vsel %vm419_vm12, %v620_v40, %v616_v56  ;;  %v815_v51 = vsel %vm419_vm12, %v814_v41, %v810_v15  ;;  %v819_v53 = vrot.slane %v733_v39, %v1359_v12  ;;  %v525_v36 = vpop.xlane.xlu0 %524  ;;  %v719_v49 = vpop.xlane.xlu1 %718  ;;  %443 = vst [vmem:[#allocation3] sm:$0x1] %v441_v34 }
 0x1b4   :  { %v626_v9 = vsel %vm426_vm13, %v625_v5, %v621_v10  ;;  %v541_v60 = vadd.f32 %v525_v36, %v1262_v0  ;;  %v735_v33 = vadd.f32 %v719_v49, %v1262_v0 }
 0x1b5   :  { %v820_v17 = vsel %vm426_vm13, %v819_v53, %v815_v51  ;;  %v631_v54 = vsel %vm433_vm14, %v630_v45, %v626_v9 }
 0x1b6   :  { %v635_v12 = vrot.slane %v541_v60, %v1356_v44  ;;  %v829_v21 = vrot.slane %v735_v33, %v1356_v44  ;;  %v825_v63 = vsel %vm433_vm14, %v824_v48, %v820_v17 }
 0x1b8   :  { %v636_v0 = vsel %vm440_vm15, %v635_v12, %v631_v54  ;;  %v830_v25 = vsel %vm440_vm15, %v829_v21, %v825_v63 }
 0x1b9   :  { %638 = vst [vmem:[#allocation3 + $0x1] sm:$0x1] %v636_v0  ;;  %832 = vst [vmem:[#allocation3 + $0x2] sm:$0x1] %v830_v25 }
 0x1ba   :  { %955 = shalt.err (!%p952_p4)
}
 0x1bb   :  { %842 = dma.vmem_to_hbm [thread:$0]  %s840_s20, 64, %s1577_s4, [#allocation4]  }
 0x1bc   :  { %964 = dma.done.wait [#allocation4], 64  }
 0x1bd   :  { %965 = vsyncadd [#allocation4], 4294967232 }
 0x1be   :  { %846 = vsyncpa [#allocation4], 1 }

</bundles_post_ra>
